<compile_context>
chip_gen: v7x
topology: tpu7x:2x2x1
jax: 0.10.0
libtpu: 0.0.40
codegen_flags: <defaults>
</compile_context>

<pallas_src>
import jax
import jax.numpy as jnp
from jax.experimental import pallas as pl
from jax.experimental.pallas import tpu as pltpu


def _pick_tile(dim, target, multiple):
    """Largest tile <= target that divides dim and is a multiple of `multiple`;
    falls back to the full dim (a full-extent block is always legal)."""
    if dim <= target:
        return dim
    t = (target // multiple) * multiple
    while t >= multiple:
        if dim % t == 0:
            return t
        t -= multiple
    return dim


# ----------------------------------------------------------------- pass 1
def _col_scale_kernel(g_ref, v_ref, scale_ref):
    # v_ref: (O, ti) -- one lane-tile of v, full output dim on sublanes.
    v = v_ref[...].astype(jnp.float32)
    sumsq = jnp.sum(v * v, axis=0, keepdims=True)          # (1, ti), XLU reduce
    scale_ref[...] = g_ref[0] * jax.lax.rsqrt(sumsq)        # g / ||v[:, i]||


def _column_scale(v, g, *, tile_i=2048):
    O, I = v.shape
    ti = _pick_tile(I, tile_i, 128)
    return pl.pallas_call(
        _col_scale_kernel,
        out_shape=jax.ShapeDtypeStruct((1, I), jnp.float32),
        grid=(I // ti,),
        in_specs=[
            pl.BlockSpec(memory_space=pltpu.MemorySpace.SMEM),  # g scalar
            pl.BlockSpec((O, ti), lambda i: (0, i)),            # v lane tile
        ],
        out_specs=pl.BlockSpec((1, ti), lambda i: (0, i)),
        compiler_params=pltpu.CompilerParams(
            dimension_semantics=("parallel",)),
    )(g, v)


# ----------------------------------------------------------------- pass 2
def _wn_matmul_kernel(x_ref, scale_ref, v_ref, b_ref, o_ref, acc_ref):
    k = pl.program_id(2)

    @pl.when(k == 0)
    def _():
        acc_ref[...] = jnp.zeros_like(acc_ref)

    # Fused weight-norm: scale the LHS columns, then hit the MXU.
    xs = x_ref[...].astype(jnp.float32) * scale_ref[...]
    acc_ref[...] += jnp.dot(xs, v_ref[...].astype(jnp.float32).T,
                            preferred_element_type=jnp.float32)

    @pl.when(k == pl.num_programs(2) - 1)
    def _():
        o_ref[...] = (acc_ref[...] + b_ref[...].astype(jnp.float32)
                      ).astype(o_ref.dtype)


def weight_norm_linear(x, v, g, bias, *, tile_m=256, tile_n=256, tile_k=512):
    """Pallas forward of the WeightNorm module: (x * (g/||v_col||)) @ v.T + bias."""
    B, I = x.shape
    O, I2 = v.shape
    assert I == I2 and bias.shape == (O,)

    scale = _column_scale(v, g.reshape(1).astype(jnp.float32))   # (1, I) f32
    bias2d = bias.reshape(1, O)                                   # metadata only

    tm = _pick_tile(B, tile_m, 8)
    tn = _pick_tile(O, tile_n, 128)
    tk = _pick_tile(I, tile_k, 128)
    grid = (B // tm, O // tn, I // tk)

    itemsize = x.dtype.itemsize
    cost = pl.CostEstimate(
        flops=2 * B * O * I,
        transcendentals=0,
        bytes_accessed=itemsize * (B * I + O * I + B * O) + 4 * (I + O),
    )

    return pl.pallas_call(
        _wn_matmul_kernel,
        out_shape=jax.ShapeDtypeStruct((B, O), x.dtype),
        grid_spec=pltpu.PrefetchScalarGridSpec(
            num_scalar_prefetch=0,
            grid=grid,
            in_specs=[
                pl.BlockSpec((tm, tk), lambda i, j, k: (i, k)),   # x
                pl.BlockSpec((1, tk), lambda i, j, k: (0, k)),    # scale
                pl.BlockSpec((tn, tk), lambda i, j, k: (j, k)),   # v
                pl.BlockSpec((1, tn), lambda i, j, k: (0, j)),    # bias
            ],
            out_specs=pl.BlockSpec((tm, tn), lambda i, j, k: (i, j)),
            scratch_shapes=[pltpu.VMEM((tm, tn), jnp.float32)],
        ),
        compiler_params=pltpu.CompilerParams(
            dimension_semantics=("parallel", "parallel", "arbitrary"),
            vmem_limit_bytes=32 * 1024 * 1024,
        ),
        cost_estimate=cost,
    )(x, scale, v, bias2d)


if __name__ == "__main__":
    key = jax.random.PRNGKey(0)
    k_x, k_v, k_g, k_b = jax.random.split(key, 4)

    batch, in_features, out_features = 2, 32, 16

    x = jax.random.normal(k_x, (batch, in_features), dtype=jnp.float32)
    # Parameter init matching WeightNorm.__init__: N(0, 0.05) for v and g.
    v = 0.05 * jax.random.normal(k_v, (out_features, in_features), dtype=jnp.float32)
    g = 0.05 * jax.random.normal(k_g, (1,), dtype=jnp.float32)
    bias = 0.05 * jax.random.normal(k_b, (out_features,), dtype=jnp.float32)

    out = weight_norm_linear(x, v, g, bias)
    out = jax.block_until_ready(out)

    # Pure-JAX reference mirroring the PyTorch forward exactly:
    #   weight = g / torch.norm(v.T, dim=-1) * v ;  out = x @ weight.T + bias
    col_norm = jnp.sqrt(jnp.sum(v * v, axis=0))          # == norm(v.T, dim=-1)
    weight = (g / col_norm) * v                           # (O, I)
    ref = x @ weight.T + bias

    assert out.shape == (batch, out_features) and out.dtype == x.dtype
    assert jnp.allclose(out, ref, atol=1e-5, rtol=1e-5), (
        float(jnp.max(jnp.abs(out - ref))))

    # TODO(synk): the wrapped self.layer's own forward/weight are never used by
    # the PyTorch module (only layer.bias), so only the weight-normalized
    # matmul path is implemented.
    print("KERNEL_OK")
</pallas_src>

<mosaic_0001>
module attributes {stable_mosaic.version = 11 : i64} {
  func.func @_col_scale_kernel(%arg0: i32, %arg1: memref<1xf32, #tpu.memory_space<smem>>, %arg2: memref<16x32xf32, #tpu.memory_space<vmem>>, %arg3: memref<1x32xf32, #tpu.memory_space<vmem>>) attributes {dimension_semantics = [#tpu.dimension_semantics<parallel>], iteration_bounds = array<i64: 1>, scalar_prefetch = 0 : i64, scratch_operands = 0 : i64, tpu.core_type = #tpu.core_type<tc>, window_params = [{transform_indices = @transform_0, window_bounds = array<i64: 1>}, {transform_indices = @transform_1, window_bounds = array<i64: 16, 32>}, {transform_indices = @transform_2, window_bounds = array<i64: 1, 32>}]} {
    %c0 = arith.constant 0 : index
    %c0_0 = arith.constant 0 : index
    %0 = vector.load %arg2[%c0, %c0_0] : memref<16x32xf32, #tpu.memory_space<vmem>>, vector<16x32xf32>
    %1 = arith.mulf %0, %0 : vector<16x32xf32>
    %cst = arith.constant dense<0.000000e+00> : vector<32xf32>
    %2 = vector.multi_reduction <add>, %1, %cst [0] : vector<16x32xf32> to vector<32xf32>
    %3 = vector.shape_cast %2 : vector<32xf32> to vector<1x32xf32>
    %c0_1 = arith.constant 0 : index
    %4 = memref.load %arg1[%c0_1] : memref<1xf32, #tpu.memory_space<smem>>
    %5 = math.rsqrt %3 : vector<1x32xf32>
    %6 = vector.broadcast %4 : f32 to vector<1x32xf32>
    %7 = arith.mulf %6, %5 : vector<1x32xf32>
    %c0_2 = arith.constant 0 : index
    %c0_3 = arith.constant 0 : index
    %8 = vector.load %arg3[%c0_2, %c0_3] : memref<1x32xf32, #tpu.memory_space<vmem>>, vector<1x32xf32>
    tpu.vector_store %arg3[%c0_2, %c0_3], %7 {strides = array<i32>} : memref<1x32xf32, #tpu.memory_space<vmem>>, vector<1x32xf32>,
    return
  }
  func.func @transform_0(%arg0: i32) -> i32 {
    %c0_i32 = arith.constant 0 : i32
    %c0_i32_0 = arith.constant 0 : i32
    return %c0_i32 : i32
  }
  func.func @transform_1(%arg0: i32) -> (i32, i32) {
    %c0_i32 = arith.constant 0 : i32
    %c0_i32_0 = arith.constant 0 : i32
    return %c0_i32, %arg0 : i32, i32
  }
  func.func @transform_2(%arg0: i32) -> (i32, i32) {
    %c0_i32 = arith.constant 0 : i32
    %c0_i32_0 = arith.constant 0 : i32
    return %c0_i32, %arg0 : i32, i32
  }
}

</mosaic_0001>

<bundles_post_ra>
// kernel: tpu_custom_call.1
= control target key start
LH: loop header
LB: loop body
LE: loop exit
PB: predicated region body
PF: predicated region fallthrough
CT: control target
= control target key end

     0   :  { %8 = vsyncpa [#allocation4], 0  ;;  %s162_s0 = inlined_call_operand.<no memory space> [shape: f32[1], index: 0, kind: input, shape index: {}]   ;;  %s163_s1 = inlined_call_operand.hbm [shape: f32[16,32], index: 1, kind: input, shape index: {}]   ;;  %s164_s2 = inlined_call_operand.hbm [shape: f32[1,32], index: 2, kind: output, shape index: {}]  }
   0x1   :  { %9 = vsyncpa [#allocation5], 0  ;;  %s116_s9 = smov [#allocation3]   ;;  %s68_s13 = scalar_lea.hbm %s163_s1, 256 }
   0x2   :  { %s17_s10 = sshll.u32 %s116_s9, 4  ;;  %p69_p0 = scmp.ne.s32.totalorder %s163_s1, %s68_s13  ;;  %s18_s10 = int_to_ptr.vmem [resolvable:$true] %s17_s10 }
   0x3   :  { %p72_p1 = scmp.lt.u32.totalorder %s68_s13, %s163_s1 }
   0x5   :  { %p74_p2 = pnand %p72_p1, %p69_p0 }
   0x7   :  { %77 = shalt.err (!%p74_p2)
}
   0x8   :  { %s78_s18 = scalar_lea.vmem %s18_s10, 256  ;;  %p83_p4 = scmp.lt.s32.totalorder %s18_s10, %s18_s10 }
   0x9   :  { %p79_p3 = scmp.ne.s32.totalorder %s18_s10, %s78_s18  ;;  %p84_p5 = scmp.lt.s32.totalorder %s78_s18, %s78_s18 }
   0xb   :  { %p85_p6 = por %p84_p5, %p83_p4 }
   0xd   :  { %p86_p7 = pnand %p85_p6, %p79_p3 }
   0xf   :  { %89 = shalt.err (!%p86_p7)
}
  0x10   :  { %s117_s19 = smov 128   ;;  %s118_s20 = smov 8  }
  0x11   :  { %23 = dma.hbm_to_vmem [thread:$0]  %s163_s1, 256, %s18_s10, [#allocation4], %s117_s19, %s117_s19, %s118_s20  }
  0x12   :  { %112 = dma.done.wait [#allocation4], 256  }
  0x13   :  { %113 = vsyncadd [#allocation4], 4294967040  ;;  %v27_v0 = vld [vmem:[#allocation3] sm:$0xff]  ;;  %v28_v1 = vld [vmem:[#allocation3 + $0x8] sm:$0xff]  ;;  %vm31_vm0 = vcmask 261120   ;;  %v43_v13 = vstv %s162_s0  ;;  %s119_s1 = smov [#allocation6]  }
  0x14   :  { %v29_v2 = vmul.f32 %v27_v0, %v27_v0  ;;  %v30_v3 = vmul.f32 %v28_v1, %v28_v1  ;;  %s53_s25 = sshll.u32 %s119_s1, 4  ;;  %vm45_vm1 = vcmask 253952   ;;  %s54_s25 = int_to_ptr.vmem [resolvable:$true] %s53_s25 }
  0x15   :  { %s90_s26 = scalar_lea.vmem %s54_s25, 16  ;;  %s94_s27 = scalar_lea.vmem %s54_s25, 32 }
  0x16   :  { %v32_v4 = vsel %vm31_vm0, %v29_v2, 0.0  ;;  %v33_v5 = vsel %vm31_vm0, %v30_v3, 0.0  ;;  %p91_p8 = scmp.ne.s32.totalorder %s54_s25, %s90_s26  ;;  %p95_p9 = scmp.lt.s32.totalorder %s54_s25, %s54_s25 }
  0x17   :  { %v34_v6 = vadd.f32 %v33_v5, %v32_v4  ;;  %p96_p10 = scmp.lt.s32.totalorder %s94_s27, %s90_s26 }
  0x19   :  { %v35_v7 = vrot.slane %v34_v6, 4  ;;  %p97_p11 = por %p96_p10, %p95_p9 }
  0x1b   :  { %v36_v8 = vadd.f32 %v35_v7, %v34_v6  ;;  %p98_p12 = pnand %p97_p11, %p91_p8 }
  0x1d   :  { %v37_v9 = vrot.slane %v36_v8, 2 }
  0x1f   :  { %v38_v10 = vadd.f32 %v37_v9, %v36_v8 }
  0x21   :  { %v39_v11 = vrot.slane %v38_v10, 1 }
  0x23   :  { %v40_v12 = vadd.f32 %v39_v11, %v38_v10 }
  0x25   :  { %66 = vrsqrt.f32 %v40_v12 }
  0x2f   :  { %v67_v14 = vpop.eup %66 }
  0x30   :  { %v44_v15 = vmul.f32 %v67_v14, %v43_v13 }
  0x32   :  { %46 = vst.msk [vmem:[#allocation6] sm:$0x1] %vm45_vm1, %v44_v15 }
  0x33   :  { %101 = shalt.err (!%p98_p12)
}
  0x34   :  { %s102_s30 = scalar_lea.hbm %s164_s2, 16 }
  0x35   :  { %p103_p13 = scmp.ne.s32.totalorder %s164_s2, %s102_s30  ;;  %p106_p0 = scmp.lt.u32.totalorder %s102_s30, %s164_s2 }
  0x37   :  { %p108_p1 = pnand %p106_p0, %p103_p13 }
  0x39   :  { %111 = shalt.err (!%p108_p1)
}
  0x3a   :  { %56 = dma.vmem_to_hbm [thread:$0]  %s54_s25, 16, %s164_s2, [#allocation5]  }
  0x3b   :  { %114 = dma.done.wait [#allocation5], 16  }
  0x3c   :  { %115 = vsyncadd [#allocation5], 4294967280 }
  0x3d   :  { %60 = vsyncpa [#allocation4], 1 }
  0x3e   :  { %61 = vsyncpa [#allocation5], 1 }

</bundles_post_ra>
